<compile_context>
chip_gen: v7x
topology: tpu7x:2x2x1
jax: 0.10.0
libtpu: 0.0.40
codegen_flags: <defaults>
</compile_context>

<pallas_src>
import jax
import jax.numpy as jnp
from jax.experimental import pallas as pl
from jax.experimental.pallas import tpu as pltpu

INPUT_DIM = 40
HIDDEN_DIM = 128
OUTPUT_DIM = 7
DEFAULT_BLOCK_B = 8192   # rows per batch tile (multiple of 8)


def _round_up(n, m):
    return ((n + m - 1) // m) * m


def _mlp_kernel(x_ref, w1_ref, b1_ref, w2_ref, b2_ref, o_ref):
    # Fully fused in VMEM: two MXU matmuls + VPU bias add / ReLU.
    x = x_ref[...]                                                     # (TB, 40)
    h = jnp.dot(x, w1_ref[...], preferred_element_type=jnp.float32)   # (TB, 128)
    h = jnp.maximum(h + b1_ref[...], 0.0)                             # bias + ReLU
    h = h.astype(w2_ref.dtype)                                        # no-op in f32 mode
    y = jnp.dot(h, w2_ref[...], preferred_element_type=jnp.float32)   # (TB, 7)
    o_ref[...] = (y + b2_ref[...]).astype(o_ref.dtype)


def speech_emotion_forward(x, w1, b1, w2, b2, *, block_b=DEFAULT_BLOCK_B, use_bf16=False):
    """x: (B, 40). w1: (40, 128), b1: (1, 128), w2: (128, 7), b2: (1, 7).
    Returns (B, 7) float32 logits, identical semantics to the PyTorch module."""
    B = x.shape[0]

    # Batch tile: multiple of 8 (f32 sublane), capped at block_b, and capped at
    # ceil(B/2) (rounded up to 8) so grid >= 2 whenever B > 8 -> both v7x TCs get work.
    tb = min(block_b, max(8, _round_up(pl.cdiv(B, 2), 8)))
    grid = (pl.cdiv(B, tb),)

    if use_bf16:
        # Weights are tiny -> cheap to cast here. For the dominant x read stream the
        # cast only helps if the *producer* emits bf16; casting here would add a pass.
        w1 = w1.astype(jnp.bfloat16)
        w2 = w2.astype(jnp.bfloat16)
        if x.dtype != jnp.bfloat16:
            x = x.astype(jnp.bfloat16)

    out = pl.pallas_call(
        _mlp_kernel,
        out_shape=jax.ShapeDtypeStruct((B, OUTPUT_DIM), jnp.float32),
        grid_spec=pltpu.PrefetchScalarGridSpec(
            num_scalar_prefetch=0,
            grid=grid,
            in_specs=[
                # x tile marches with the batch grid index (double-buffered DMA).
                pl.BlockSpec((tb, INPUT_DIM), lambda i: (i, 0)),
                # Weights / biases: constant block index -> resident in VMEM.
                pl.BlockSpec((INPUT_DIM, HIDDEN_DIM), lambda i: (0, 0)),
                pl.BlockSpec((1, HIDDEN_DIM), lambda i: (0, 0)),
                pl.BlockSpec((HIDDEN_DIM, OUTPUT_DIM), lambda i: (0, 0)),
                pl.BlockSpec((1, OUTPUT_DIM), lambda i: (0, 0)),
            ],
            # Compact (tb, 7) output block; last dim equals the full array dim.
            out_specs=pl.BlockSpec((tb, OUTPUT_DIM), lambda i: (i, 0)),
        ),
        compiler_params=pltpu.CompilerParams(
            # Independent batch tiles -> shard across TensorCores on v7x.
            dimension_semantics=("parallel",),
            # Covers double-buffered (tb x 128-lane-padded) x/out tiles at tb=8192
            # (~16-17 MiB) on all generations; v5e's 16 MiB scoped default is too tight.
            vmem_limit_bytes=32 * 1024 * 1024,
        ),
    )(x, w1, b1, w2, b2)

    return out


def init_params(key):
    # Deterministic init mirroring nn.Linear's U(-1/sqrt(fan_in), 1/sqrt(fan_in)).
    k1, k2, k3, k4 = jax.random.split(key, 4)
    lim1 = 1.0 / jnp.sqrt(float(INPUT_DIM))
    lim2 = 1.0 / jnp.sqrt(float(HIDDEN_DIM))
    w1 = jax.random.uniform(k1, (INPUT_DIM, HIDDEN_DIM), jnp.float32, -lim1, lim1)
    b1 = jax.random.uniform(k2, (1, HIDDEN_DIM), jnp.float32, -lim1, lim1)
    w2 = jax.random.uniform(k3, (HIDDEN_DIM, OUTPUT_DIM), jnp.float32, -lim2, lim2)
    b2 = jax.random.uniform(k4, (1, OUTPUT_DIM), jnp.float32, -lim2, lim2)
    return w1, b1, w2, b2


def reference_forward(x, w1, b1, w2, b2):
    h = jnp.maximum(x @ w1 + b1, 0.0)
    return h @ w2 + b2


if __name__ == "__main__":
    key = jax.random.PRNGKey(0)
    kx, kp = jax.random.split(key)
    w1, b1, w2, b2 = init_params(kp)

    # Small batch (single grid step).
    batch = 8
    x = jax.random.normal(kx, (batch, INPUT_DIM), jnp.float32)
    out = jax.block_until_ready(speech_emotion_forward(x, w1, b1, w2, b2))
    ref = reference_forward(x, w1, b1, w2, b2)
    assert out.shape == (batch, OUTPUT_DIM)
    assert jnp.allclose(out, ref, atol=1e-5, rtol=1e-5)

    # Non-tile-multiple batch: exercises grid=2 (parallel axis) and the ragged
    # edge block (masked output writeback, no wrapper-side padding).
    batch2 = 20
    x2 = jax.random.normal(jax.random.PRNGKey(1), (batch2, INPUT_DIM), jnp.float32)
    out2 = jax.block_until_ready(speech_emotion_forward(x2, w1, b1, w2, b2))
    ref2 = reference_forward(x2, w1, b1, w2, b2)
    assert out2.shape == (batch2, OUTPUT_DIM)
    assert jnp.allclose(out2, ref2, atol=1e-5, rtol=1e-5)

    print("KERNEL_OK")
</pallas_src>

<mosaic_0001>
module attributes {stable_mosaic.version = 11 : i64} {
  func.func @_mlp_kernel(%arg0: i32, %arg1: memref<8x40xf32, #tpu.memory_space<vmem>>, %arg2: memref<40x128xf32, #tpu.memory_space<vmem>>, %arg3: memref<1x128xf32, #tpu.memory_space<vmem>>, %arg4: memref<128x7xf32, #tpu.memory_space<vmem>>, %arg5: memref<1x7xf32, #tpu.memory_space<vmem>>, %arg6: memref<8x7xf32, #tpu.memory_space<vmem>>) attributes {dimension_semantics = [#tpu.dimension_semantics<parallel>], iteration_bounds = array<i64: 1>, scalar_prefetch = 0 : i64, scratch_operands = 0 : i64, tpu.core_type = #tpu.core_type<tc>, window_params = [{transform_indices = @transform_0, window_bounds = array<i64: 8, 40>}, {pipeline_mode = #tpu.pipeline_mode<synchronous>, transform_indices = @transform_1, window_bounds = array<i64: 40, 128>}, {pipeline_mode = #tpu.pipeline_mode<synchronous>, transform_indices = @transform_2, window_bounds = array<i64: 1, 128>}, {pipeline_mode = #tpu.pipeline_mode<synchronous>, transform_indices = @transform_3, window_bounds = array<i64: 128, 7>}, {pipeline_mode = #tpu.pipeline_mode<synchronous>, transform_indices = @transform_4, window_bounds = array<i64: 1, 7>}, {transform_indices = @transform_5, window_bounds = array<i64: 8, 7>}]} {
    %c0 = arith.constant 0 : index
    %c0_0 = arith.constant 0 : index
    %0 = vector.load %arg1[%c0, %c0_0] : memref<8x40xf32, #tpu.memory_space<vmem>>, vector<8x40xf32>
    %c0_1 = arith.constant 0 : index
    %c0_2 = arith.constant 0 : index
    %1 = vector.load %arg2[%c0_1, %c0_2] : memref<40x128xf32, #tpu.memory_space<vmem>>, vector<40x128xf32>
    %cst = arith.constant dense<0.000000e+00> : vector<8x128xf32>
    %2 = tpu.matmul %0, %1, %cst {dimension_numbers = #tpu.dot_dimension_numbers<[1], [0], [0], [1], [0, 0, 1, 1], [], []>} : vector<8x40xf32>, vector<40x128xf32>, vector<8x128xf32> -> vector<8x128xf32>
    %c0_3 = arith.constant 0 : index
    %c0_4 = arith.constant 0 : index
    %3 = vector.load %arg3[%c0_3, %c0_4] : memref<1x128xf32, #tpu.memory_space<vmem>>, vector<1x128xf32>
    %4 = vector.broadcast %3 : vector<1x128xf32> to vector<8x128xf32>
    %5 = arith.addf %2, %4 : vector<8x128xf32>
    %cst_5 = arith.constant 0.000000e+00 : f32
    %6 = vector.broadcast %cst_5 : f32 to vector<8x128xf32>
    %7 = arith.maximumf %5, %6 : vector<8x128xf32>
    %c0_6 = arith.constant 0 : index
    %c0_7 = arith.constant 0 : index
    %8 = vector.load %arg4[%c0_6, %c0_7] : memref<128x7xf32, #tpu.memory_space<vmem>>, vector<128x7xf32>
    %cst_8 = arith.constant dense<0.000000e+00> : vector<8x7xf32>
    %9 = tpu.matmul %7, %8, %cst_8 {dimension_numbers = #tpu.dot_dimension_numbers<[1], [0], [0], [1], [0, 0, 1, 1], [], []>} : vector<8x128xf32>, vector<128x7xf32>, vector<8x7xf32> -> vector<8x7xf32>
    %c0_9 = arith.constant 0 : index
    %c0_10 = arith.constant 0 : index
    %10 = vector.load %arg5[%c0_9, %c0_10] : memref<1x7xf32, #tpu.memory_space<vmem>>, vector<1x7xf32>
    %11 = vector.broadcast %10 : vector<1x7xf32> to vector<8x7xf32>
    %12 = arith.addf %9, %11 : vector<8x7xf32>
    %c0_11 = arith.constant 0 : index
    %c0_12 = arith.constant 0 : index
    %13 = vector.load %arg6[%c0_11, %c0_12] : memref<8x7xf32, #tpu.memory_space<vmem>>, vector<8x7xf32>
    tpu.vector_store %arg6[%c0_11, %c0_12], %12 {strides = array<i32>} : memref<8x7xf32, #tpu.memory_space<vmem>>, vector<8x7xf32>,
    return
  }
  func.func @transform_0(%arg0: i32) -> (i32, i32) {
    %c0_i32 = arith.constant 0 : i32
    %c0_i32_0 = arith.constant 0 : i32
    return %arg0, %c0_i32 : i32, i32
  }
  func.func @transform_1(%arg0: i32) -> (i32, i32) {
    %c0_i32 = arith.constant 0 : i32
    %c0_i32_0 = arith.constant 0 : i32
    %c0_i32_1 = arith.constant 0 : i32
    return %c0_i32, %c0_i32_0 : i32, i32
  }
  func.func @transform_2(%arg0: i32) -> (i32, i32) {
    %c0_i32 = arith.constant 0 : i32
    %c0_i32_0 = arith.constant 0 : i32
    %c0_i32_1 = arith.constant 0 : i32
    return %c0_i32, %c0_i32_0 : i32, i32
  }
  func.func @transform_3(%arg0: i32) -> (i32, i32) {
    %c0_i32 = arith.constant 0 : i32
    %c0_i32_0 = arith.constant 0 : i32
    %c0_i32_1 = arith.constant 0 : i32
    return %c0_i32, %c0_i32_0 : i32, i32
  }
  func.func @transform_4(%arg0: i32) -> (i32, i32) {
    %c0_i32 = arith.constant 0 : i32
    %c0_i32_0 = arith.constant 0 : i32
    %c0_i32_1 = arith.constant 0 : i32
    return %c0_i32, %c0_i32_0 : i32, i32
  }
  func.func @transform_5(%arg0: i32) -> (i32, i32) {
    %c0_i32 = arith.constant 0 : i32
    %c0_i32_0 = arith.constant 0 : i32
    return %arg0, %c0_i32 : i32, i32
  }
}

</mosaic_0001>

<bundles_post_ra>
// kernel: tpu_custom_call.1
= control target key start
LH: loop header
LB: loop body
LE: loop exit
PB: predicated region body
PF: predicated region fallthrough
CT: control target
= control target key end

     0   :  { %v350_v3 = vmov 0.0|0.0   ;;  %vm351_vm0 = vmmov 0   ;;  %v352_v6 = vmov 0.0   ;;  %s468_s0 = inlined_call_operand.vmem [shape: f32[8,40], index: 0, kind: input, shape index: {}]   ;;  %s469_s1 = inlined_call_operand.vmem [shape: f32[40,128], index: 1, kind: input, shape index: {}]   ;;  %s470_s2 = inlined_call_operand.vmem [shape: f32[1,128], index: 2, kind: input, shape index: {}]   ;;  %s471_s3 = inlined_call_operand.vmem [shape: f32[128,7], index: 3, kind: input, shape index: {}]   ;;  %s472_s4 = inlined_call_operand.vmem [shape: f32[1,7], index: 4, kind: input, shape index: {}]   ;;  %s473_s5 = inlined_call_operand.hbm [shape: f32[8,7], index: 5, kind: output, shape index: {}]  }
   0x1   :  { %v22_v0 = vld [vmem:[%s469_s1] sm:$0xff]  ;;  %v23_v1 = vld [vmem:[%s469_s1 + $0x8] sm:$0xff]  ;;  %v24_v2 = vld [vmem:[%s469_s1 + $0x10] sm:$0xff]  ;;  %292 = vmatprep.subr.bf16.mxu0 %v350_v3  ;;  %254 = vmatprep.mubr.msk.f32.mxu0 %vm351_vm0, %v352_v6 }
   0x2   :  { %v293_v4 = vpack.c.bf16 %v23_v1, %v22_v0  ;;  %v25_v5 = vld [vmem:[%s469_s1 + $0x18] sm:$0xff]  ;;  %298 = vmatprep.subr.bf16.mxu1 %v350_v3  ;;  %v109_v7 = vld [vmem:[%s471_s3] sm:$0xff]  ;;  %v110_v8 = vld [vmem:[%s471_s3 + $0x8] sm:$0xff]  ;;  %289 = vmatprep.mubr.msk.f32.mxu1 %vm351_vm0, %v352_v6 }
   0x3   :  { %v111_v9 = vld [vmem:[%s471_s3 + $0x10] sm:$0xff]  ;;  %v296_v10 = vpack.c.bf16 %v25_v5, %v24_v2  ;;  %v299_v11 = vpack.c.bf16 %v110_v8, %v109_v7  ;;  %v112_v12 = vld [vmem:[%s471_s3 + $0x18] sm:$0xff]  ;;  %v113_v14 = vld [vmem:[%s471_s3 + $0x20] sm:$0xff] }
   0x4   :  { %294 = vmatpush3.bf16.msra.mxu0 %v293_v4  ;;  %v302_v13 = vpack.c.bf16 %v112_v12, %v111_v9  ;;  %v114_v15 = vld [vmem:[%s471_s3 + $0x28] sm:$0xff] }
   0x5   :  { %295 = vmatprep.subr.bf16.mxu0 %v350_v3  ;;  %300 = vmatpush3.bf16.msra.mxu1 %v299_v11 }
   0x6   :  { %301 = vmatprep.subr.bf16.mxu1 %v350_v3 }
   0x8   :  { %297 = vmatpush3.bf16.msra.mxu0 %v296_v10 }
   0x9   :  { %10 = vsyncpa [#allocation3], 0  ;;  %252 = vmatprep.subr.mxu0 %v352_v6  ;;  %v26_v16 = vld [vmem:[%s469_s1 + $0x20] sm:$0xff]  ;;  %vm34_vm1 = vcmask 326656   ;;  %303 = vmatpush3.bf16.msra.mxu1 %v302_v13  ;;  %v305_v18 = vpack.c.bf16 %v114_v15, %v113_v14  ;;  %v115_v19 = vld [vmem:[%s471_s3 + $0x30] sm:$0xff]  ;;  %s353_s14 = smov [#allocation2]  }
   0xa   :  { %v21_v17 = vld [vmem:[%s468_s0] sm:$0xff]  ;;  %304 = vmatprep.subr.bf16.mxu1 %v350_v3  ;;  %v116_v20 = vld [vmem:[%s471_s3 + $0x38] sm:$0xff]  ;;  %v118_v23 = vld [vmem:[%s471_s3 + $0x48] sm:$0xff]  ;;  %s210_s15 = sshll.u32 %s353_s14, 4  ;;  %vm202_vm2 = vcmask 56320   ;;  %s211_s15 = int_to_ptr.vmem [resolvable:$true] %s210_s15 }
   0xb   :  { %v308_v21 = vpack.c.bf16 %v116_v20, %v115_v19  ;;  %v117_v22 = vld [vmem:[%s471_s3 + $0x40] sm:$0xff]  ;;  %v119_v25 = vld [vmem:[%s471_s3 + $0x50] sm:$0xff]  ;;  %v120_v26 = vld [vmem:[%s471_s3 + $0x58] sm:$0xff]  ;;  %p331_p1 = scmp.lt.s32.totalorder %s211_s15, %s211_s15 }
   0xc   :  { %253 = vmatpush3.msra.mxu0 %v26_v16  ;;  %v311_v24 = vpack.c.bf16 %v118_v23, %v117_v22  ;;  %v314_v27 = vpack.c.bf16 %v120_v26, %v119_v25  ;;  %v121_v28 = vld [vmem:[%s471_s3 + $0x60] sm:$0xff]  ;;  %v122_v29 = vld [vmem:[%s471_s3 + $0x68] sm:$0xff]  ;;  %v123_v31 = vld [vmem:[%s471_s3 + $0x70] sm:$0xff] }
   0xd   :  { %255 = vmatmul.mubr.msk.f32.vlgmr.msra.gmra.mrb[0].mxu0 %vm34_vm1, %v21_v17  ;;  %306 = vmatpush3.bf16.msra.mxu1 %v305_v18  ;;  %v317_v30 = vpack.c.bf16 %v122_v29, %v121_v28  ;;  %v124_v32 = vld [vmem:[%s471_s3 + $0x78] sm:$0xff]  ;;  %v218_v34 = vld [vmem:[%s470_s2] ss:$0 sm:$0xff]  ;;  %s326_s3 = scalar_lea.vmem %s211_s15, 128 }
   0xe   :  { %307 = vmatprep.subr.bf16.mxu1 %v350_v3  ;;  %v320_v33 = vpack.c.bf16 %v124_v32, %v123_v31  ;;  %v220_v39 = vld [vmem:[%s472_s4] ss:$0 sm:$0xff]  ;;  %p327_p0 = scmp.ne.s32.totalorder %s211_s15, %s326_s3  ;;  %p332_p2 = scmp.lt.s32.totalorder %s326_s3, %s326_s3 }
  0x10   :  { %p333_p3 = por %p332_p2, %p331_p1 }
  0x11   :  { %309 = vmatpush3.bf16.msra.mxu1 %v308_v21 }
  0x12   :  { %310 = vmatprep.subr.bf16.mxu1 %v350_v3  ;;  %p334_p4 = pnand %p333_p3, %p327_p0 }
  0x15   :  { %312 = vmatpush3.bf16.msra.mxu1 %v311_v24 }
  0x16   :  { %313 = vmatprep.subr.bf16.mxu1 %v350_v3 }
  0x19   :  { %315 = vmatpush3.bf16.msra.mxu1 %v314_v27 }
  0x1a   :  { %316 = vmatprep.subr.bf16.mxu1 %v350_v3 }
  0x1d   :  { %318 = vmatpush3.bf16.msra.mxu1 %v317_v30 }
  0x1e   :  { %319 = vmatprep.subr.bf16.mxu1 %v350_v3 }
  0x21   :  { %321 = vmatpush3.bf16.msra.mxu1 %v320_v33 }
  0xe0   :  { %v104_v35 = vpop.f32.mrb[0].mxu0 }
  0xe1   :  { %v105_v36 = vadd.f32 %v218_v34, %v104_v35  ;;  %v256_v37 = vpop.f32.mrb[1].mxu0 }
  0xe3   :  { %v108_v38 = vmax.f32 %v105_v36, 0.0 }
  0xe5   :  { %290 = vmatmul.mubr.f32.vlgmr.msra.gmra.mrb[0].mxu1 %v108_v38 }
 0x1b8   :  { %v198_v40 = vpop.f32.mrb[0].mxu1 }
 0x1b9   :  { %v199_v41 = vadd.f32 %v220_v39, %v198_v40  ;;  %v291_v42 = vpop.f32.mrb[1].mxu1 }
 0x1bb   :  { %203 = vst.msk [vmem:[#allocation2] sm:$0xff] %vm202_vm2, %v199_v41 }
 0x1bc   :  { %337 = shalt.err (!%p334_p4)
}
 0x1bd   :  { %s338_s17 = scalar_lea.hbm %s473_s5, 128 }
 0x1be   :  { %p339_p5 = scmp.ne.s32.totalorder %s473_s5, %s338_s17  ;;  %p342_p6 = scmp.lt.u32.totalorder %s338_s17, %s473_s5 }
 0x1c0   :  { %p344_p7 = pnand %p342_p6, %p339_p5 }
 0x1c2   :  { %347 = shalt.err (!%p344_p7)
}
 0x1c3   :  { %213 = dma.vmem_to_hbm [thread:$0]  %s211_s15, 128, %s473_s5, [#allocation3]  }
 0x1c4   :  { %348 = dma.done.wait [#allocation3], 128  }
 0x1c5   :  { %349 = vsyncadd [#allocation3], 4294967168 }
 0x1c6   :  { %217 = vsyncpa [#allocation3], 1 }

</bundles_post_ra>
